<compile_context>
chip_gen: v7x
topology: tpu7x:2x2x1
jax: 0.10.0
libtpu: 0.0.40
codegen_flags: <defaults>
</compile_context>

<pallas_src>
import functools

import numpy as np
import jax
import jax.numpy as jnp
from jax.experimental import pallas as pl
from jax.experimental.pallas import tpu as pltpu

VMEM_LIMIT = 32 * 1024 * 1024             # v7x-safe (64 MiB physical / 32 MiB scoped default)
MAX_WEIGHT_TILE_BYTES = 4 * 1024 * 1024   # K-tile any conv weight bigger than this
ACT_DTYPE = jnp.bfloat16                  # weights & activations stream bf16, accumulate f32


# ----------------------------------------------------------------------------- kernels

def _conv_kernel_single(x_ref, w_ref, b_ref, o_ref, *, relu):
    # Single K step: o = relu(x @ w + b).
    # x:(tm,K) bf16, w:(K,Cout) bf16 (BN scale pre-folded), b:(1,Cout) f32, o:(tm,Cout) bf16.
    y = jnp.dot(x_ref[...], w_ref[...], preferred_element_type=jnp.float32)
    y = y + b_ref[...]
    if relu:
        y = jnp.maximum(y, 0.0)
    o_ref[...] = y.astype(o_ref.dtype)


def _conv_kernel_ktiled(x_ref, w_ref, b_ref, o_ref, acc_ref, *, relu):
    # K-tiled: stream the weight in (tk, Cout) chunks, accumulate partial products in an
    # f32 VMEM scratch, epilogue (bias + ReLU + cast) only on the last K step.
    @pl.when(pl.program_id(1) == 0)
    def _():
        acc_ref[...] = jnp.zeros_like(acc_ref)

    acc_ref[...] += jnp.dot(x_ref[...], w_ref[...],
                            preferred_element_type=jnp.float32)

    @pl.when(pl.program_id(1) == pl.num_programs(1) - 1)
    def _():
        y = acc_ref[...] + b_ref[...]
        if relu:
            y = jnp.maximum(y, 0.0)
        o_ref[...] = y.astype(o_ref.dtype)


# ----------------------------------------------------------------------------- conv wrapper

def _pick_tm(m, tmax=256):
    """M tile: whole M if small, else the largest power-of-two tile <= tmax dividing M."""
    if m <= tmax:
        return m
    tm = tmax
    while m % tm:
        tm //= 2
    return tm


def _pick_tk(k, cout, itemsize):
    """K tile: full K for small weights / non-128-multiples, else the largest multiple of
    128 that divides K and keeps one weight tile under MAX_WEIGHT_TILE_BYTES."""
    if k % 128 != 0 or k * cout * itemsize <= MAX_WEIGHT_TILE_BYTES:
        return k
    tk = 128
    for mult in range(1, k // 128 + 1):
        cand = 128 * mult
        if k % cand == 0 and cand * cout * itemsize <= MAX_WEIGHT_TILE_BYTES:
            tk = cand
    return tk


def conv_mm(x_flat, w, bias, *, relu):
    """Fused conv-as-matmul: (M, K) @ (K, Cout) + bias, optional ReLU -> (M, Cout) bf16."""
    M, K = x_flat.shape
    Cout = w.shape[1]
    tm = _pick_tm(M)
    tk = _pick_tk(K, Cout, jnp.dtype(w.dtype).itemsize)
    mt, kt = M // tm, K // tk

    if kt == 1:
        kern = functools.partial(_conv_kernel_single, relu=relu)
        scratch = []
    else:
        kern = functools.partial(_conv_kernel_ktiled, relu=relu)
        scratch = [pltpu.VMEM((tm, Cout), jnp.float32)]

    return pl.pallas_call(
        kern,
        out_shape=jax.ShapeDtypeStruct((M, Cout), ACT_DTYPE),
        grid=(mt, kt),
        in_specs=[
            pl.BlockSpec((tm, tk), lambda m, k: (m, k)),
            pl.BlockSpec((tk, Cout), lambda m, k: (k, 0)),
            pl.BlockSpec((1, Cout), lambda m, k: (0, 0)),
        ],
        out_specs=pl.BlockSpec((tm, Cout), lambda m, k: (m, 0)),
        scratch_shapes=scratch,
        compiler_params=pltpu.CompilerParams(
            dimension_semantics=("parallel", "arbitrary"),
            vmem_limit_bytes=VMEM_LIMIT),
    )(x_flat, w, bias.reshape(1, Cout))


# ----------------------------------------------------------------------------- layers

def _im2col3x3(x):
    """NHWC x -> (N*H*W, 9*C) patches for a 3x3 / pad=1 conv (layout glue, plain JAX)."""
    N, H, W, C = x.shape
    xp = jnp.pad(x, ((0, 0), (1, 1), (1, 1), (0, 0)))
    cols = [xp[:, dy:dy + H, dx:dx + W, :] for dy in range(3) for dx in range(3)]
    patches = jnp.concatenate(cols, axis=-1)          # (N, H, W, 9*C), (dy, dx, cin) order
    return patches.reshape(N * H * W, 9 * C)


def conv3x3_bn_relu(x, p):
    """x: NHWC bf16; p: {'w': (9*Cin, Cout) bf16 (BN-scale folded), 'bias': (Cout,) f32}."""
    N, H, W, _ = x.shape
    out = conv_mm(_im2col3x3(x), p["w"], p["bias"], relu=True)
    return out.reshape(N, H, W, -1)


def double_conv(x, p):
    return conv3x3_bn_relu(conv3x3_bn_relu(x, p["c1"]), p["c2"])


def maxpool2x2(x):
    # Tiny elementwise op — plain JAX (reshape + max) instead of a dedicated pallas_call.
    N, H, W, C = x.shape
    return x.reshape(N, H // 2, 2, W // 2, 2, C).max(axis=(2, 4))


def _lin_idx(n_in, n_out):
    """1-D bilinear indices/fractions, PyTorch align_corners=True semantics (static)."""
    if n_in == 1:
        z = np.zeros((n_out,), np.int32)
        return z, z, np.zeros((n_out,), np.float32)
    s = np.arange(n_out, dtype=np.float64) * ((n_in - 1) / (n_out - 1))
    i0 = np.clip(np.floor(s).astype(np.int32), 0, n_in - 1)
    i1 = np.minimum(i0 + 1, n_in - 1)
    return i0, i1, (s - i0).astype(np.float32)


def upsample_bilinear_x2(x):
    # Separable gather + lerp in plain JAX: the contraction dims (1..64) are far below MXU
    # width and the kron matrix would be O(H^2*W^2) VMEM, so a matmul kernel is a poor fit.
    N, H, W, C = x.shape
    Ho, Wo = 2 * H, 2 * W
    y0, y1, fy = _lin_idx(H, Ho)
    x0, x1, fx = _lin_idx(W, Wo)
    xr = x.astype(jnp.float32)
    fyb = jnp.asarray(fy)[None, :, None, None]
    rows = xr[:, y0, :, :] * (1.0 - fyb) + xr[:, y1, :, :] * fyb       # (N, Ho, W, C)
    fxb = jnp.asarray(fx)[None, None, :, None]
    out = rows[:, :, x0, :] * (1.0 - fxb) + rows[:, :, x1, :] * fxb    # (N, Ho, Wo, C)
    return out.astype(x.dtype)


def up_block(x, skip, p):
    xu = upsample_bilinear_x2(x)
    dY = skip.shape[1] - xu.shape[1]
    dX = skip.shape[2] - xu.shape[2]
    if dY or dX:   # F.pad([dX//2, dX-dX//2, dY//2, dY-dY//2]) — no-op for power-of-2 sizes
        xu = jnp.pad(xu, ((0, 0), (dY // 2, dY - dY // 2),
                          (dX // 2, dX - dX // 2), (0, 0)))
    x = jnp.concatenate([skip, xu], axis=-1)           # torch.cat([x2, x1], dim=1)
    return double_conv(x, p)


def late_sup_unet(x_nchw, params):
    x = jnp.transpose(x_nchw, (0, 2, 3, 1)).astype(ACT_DTYPE)     # NCHW -> NHWC, bf16 stream
    x1 = double_conv(x, params["inc"])
    x2 = double_conv(maxpool2x2(x1), params["down1"])
    x3 = double_conv(maxpool2x2(x2), params["down2"])
    x4 = double_conv(maxpool2x2(x3), params["down3"])
    x5 = double_conv(maxpool2x2(x4), params["down4"])
    y = up_block(x5, x4, params["up1"])
    y = up_block(y, x3, params["up2"])
    y = up_block(y, x2, params["up3"])
    y = up_block(y, x1, params["up4"])
    # OutConv: 1x1 conv 64->1.  Tiny (Cout=1 lane-masked stores) — plain JAX dot in f32.
    N, H, W, C = y.shape
    oc = params["outc"]
    out = jnp.dot(y.reshape(N * H * W, C).astype(jnp.float32), oc["w"]) + oc["bias"]
    out = out.reshape(N, H, W, 1)
    return jnp.transpose(out, (0, 3, 1, 2))            # NHWC -> NCHW


# ----------------------------------------------------------------------------- params

def _conv_bn_params(key, cin, cout):
    kw, kg, kb, km, kv = jax.random.split(key, 5)
    # PyTorch Conv2d weight is (Cout, Cin, 3, 3); we build it directly as (3, 3, Cin, Cout)
    # and flatten to (9*Cin, Cout) matching the (dy, dx, cin) im2col channel ordering.
    w = jax.random.normal(kw, (3, 3, cin, cout), jnp.float32) / np.sqrt(9 * cin)
    gamma = jax.random.uniform(kg, (cout,), jnp.float32, 0.5, 1.5)
    beta = jax.random.normal(kb, (cout,), jnp.float32) * 0.1
    rmean = jax.random.normal(km, (cout,), jnp.float32) * 0.1
    rvar = jax.random.uniform(kv, (cout,), jnp.float32, 0.5, 1.5)
    eps = 1e-5
    scale = gamma / jnp.sqrt(rvar + eps)               # eval-mode BN folded to affine
    bias = beta - rmean * scale
    # Fold the BN scale directly into the conv weight; stream the weight as bf16.
    # TODO(synk): int8 per-channel weight quantization (v5e/v6e only) not implemented.
    w_folded = (w.reshape(9 * cin, cout) * scale[None, :]).astype(ACT_DTYPE)
    return {"w": w_folded, "bias": bias}


def _double_conv_params(key, cin, cout, cmid=None):
    cmid = cmid if cmid is not None else cout
    k1, k2 = jax.random.split(key)
    return {"c1": _conv_bn_params(k1, cin, cmid),
            "c2": _conv_bn_params(k2, cmid, cout)}


def init_params(key):
    ks = jax.random.split(key, 10)
    params = {
        "inc":   _double_conv_params(ks[0], 1, 64),
        "down1": _double_conv_params(ks[1], 64, 128),
        "down2": _double_conv_params(ks[2], 128, 256),
        "down3": _double_conv_params(ks[3], 256, 512),
        "down4": _double_conv_params(ks[4], 512, 512),          # 1024 // factor
        "up1":   _double_conv_params(ks[5], 1024, 256, 512),    # DoubleConv(1024, 512//2, 512)
        "up2":   _double_conv_params(ks[6], 512, 128, 256),
        "up3":   _double_conv_params(ks[7], 256, 64, 128),
        "up4":   _double_conv_params(ks[8], 128, 64, 64),
    }
    kw, kb = jax.random.split(ks[9])
    params["outc"] = {
        "w": jax.random.normal(kw, (64, 1), jnp.float32) / 8.0,
        "bias": jax.random.normal(kb, (1,), jnp.float32) * 0.1,
    }
    return params


# ----------------------------------------------------------------------------- main

if __name__ == "__main__":
    key = jax.random.PRNGKey(0)
    kx, kp = jax.random.split(key)
    # n_channels=1, NCHW like PyTorch; spatial 16 survives the 4 downsamplings (16->8->4->2->1)
    x = jax.random.normal(kx, (2, 1, 16, 16), jnp.float32)
    params = init_params(kp)
    out = late_sup_unet(x, params)
    out = jax.block_until_ready(out)
    assert out.shape == (2, 1, 16, 16) and out.dtype == jnp.float32
    assert bool(jnp.all(jnp.isfinite(out)))
    print("KERNEL_OK")
</pallas_src>

<mosaic_0001>
module attributes {stable_mosaic.version = 11 : i64} {
  func.func @_conv_kernel_single(%arg0: i32, %arg1: i32, %arg2: memref<256x9xbf16, #tpu.memory_space<vmem>>, %arg3: memref<9x64xbf16, #tpu.memory_space<vmem>>, %arg4: memref<1x64xf32, #tpu.memory_space<vmem>>, %arg5: memref<256x64xbf16, #tpu.memory_space<vmem>>) attributes {dimension_semantics = [#tpu.dimension_semantics<parallel>, #tpu.dimension_semantics<arbitrary>], iteration_bounds = array<i64: 2, 1>, scalar_prefetch = 0 : i64, scratch_operands = 0 : i64, tpu.core_type = #tpu.core_type<tc>, window_params = [{transform_indices = @transform_0, window_bounds = array<i64: 256, 9>}, {transform_indices = @transform_1, window_bounds = array<i64: 9, 64>}, {pipeline_mode = #tpu.pipeline_mode<synchronous>, transform_indices = @transform_2, window_bounds = array<i64: 1, 64>}, {transform_indices = @transform_3, window_bounds = array<i64: 256, 64>}]} {
    %c0 = arith.constant 0 : index
    %c0_0 = arith.constant 0 : index
    %0 = vector.load %arg2[%c0, %c0_0] : memref<256x9xbf16, #tpu.memory_space<vmem>>, vector<256x9xbf16>
    %c0_1 = arith.constant 0 : index
    %c0_2 = arith.constant 0 : index
    %1 = vector.load %arg3[%c0_1, %c0_2] : memref<9x64xbf16, #tpu.memory_space<vmem>>, vector<9x64xbf16>
    %cst = arith.constant dense<0.000000e+00> : vector<256x64xf32>
    %2 = tpu.matmul %0, %1, %cst {dimension_numbers = #tpu.dot_dimension_numbers<[1], [0], [0], [1], [0, 0, 1, 1], [], []>} : vector<256x9xbf16>, vector<9x64xbf16>, vector<256x64xf32> -> vector<256x64xf32>
    %c0_3 = arith.constant 0 : index
    %c0_4 = arith.constant 0 : index
    %3 = vector.load %arg4[%c0_3, %c0_4] : memref<1x64xf32, #tpu.memory_space<vmem>>, vector<1x64xf32>
    %4 = vector.broadcast %3 : vector<1x64xf32> to vector<256x64xf32>
    %5 = arith.addf %2, %4 : vector<256x64xf32>
    %cst_5 = arith.constant 0.000000e+00 : f32
    %6 = vector.broadcast %cst_5 : f32 to vector<256x64xf32>
    %7 = arith.maximumf %5, %6 : vector<256x64xf32>
    %8 = arith.truncf %7 : vector<256x64xf32> to vector<256x64xbf16>
    %c0_6 = arith.constant 0 : index
    %c0_7 = arith.constant 0 : index
    %9 = vector.load %arg5[%c0_6, %c0_7] : memref<256x64xbf16, #tpu.memory_space<vmem>>, vector<256x64xbf16>
    tpu.vector_store %arg5[%c0_6, %c0_7], %8 {strides = array<i32>} : memref<256x64xbf16, #tpu.memory_space<vmem>>, vector<256x64xbf16>,
    return
  }
  func.func @transform_0(%arg0: i32, %arg1: i32) -> (i32, i32) {
    %c0_i32 = arith.constant 0 : i32
    return %arg0, %arg1 : i32, i32
  }
  func.func @transform_1(%arg0: i32, %arg1: i32) -> (i32, i32) {
    %c0_i32 = arith.constant 0 : i32
    %c0_i32_0 = arith.constant 0 : i32
    return %arg1, %c0_i32 : i32, i32
  }
  func.func @transform_2(%arg0: i32, %arg1: i32) -> (i32, i32) {
    %c0_i32 = arith.constant 0 : i32
    %c0_i32_0 = arith.constant 0 : i32
    %c0_i32_1 = arith.constant 0 : i32
    return %c0_i32, %c0_i32_0 : i32, i32
  }
  func.func @transform_3(%arg0: i32, %arg1: i32) -> (i32, i32) {
    %c0_i32 = arith.constant 0 : i32
    %c0_i32_0 = arith.constant 0 : i32
    return %arg0, %c0_i32 : i32, i32
  }
}

</mosaic_0001>

<bundles_post_ra>
// kernel: tpu_custom_call.1
= control target key start
LH: loop header
LB: loop body
LE: loop exit
PB: predicated region body
PF: predicated region fallthrough
CT: control target
= control target key end

     0   :  { %s1089_s12 = smov 0   ;;  %s1091_s13 = smov 0   ;;  %s1269_s0 = inlined_call_operand.vmem [shape: bf16[512,9], index: 0, kind: input, shape index: {}]   ;;  %s1270_s1 = inlined_call_operand.vmem [shape: bf16[9,64], index: 1, kind: input, shape index: {}]   ;;  %s1271_s2 = inlined_call_operand.vmem [shape: f32[1,64], index: 2, kind: input, shape index: {}]   ;;  %s1272_s3 = inlined_call_operand.vmem [shape: bf16[512,64], index: 3, kind: output, shape index: {}]  }
   0x1   :  { %s1093_s14 = smov 0  }
   0x2 LB: > { %s25_s15 = sadd.s32 1, %s1062_s13  ;;  %p844_p0 = scmp.ge.s32.totalorder %s1066_s14, 1  ;;  %s1066_s14 = sphi %s1093_s14, %s13_s14   ;;  %s1062_s13 = sphi %s1091_s13, %s1274_s13   ;;  %s1058_s12 = sphi %s1089_s12, %s1273_s12  }
   0x3   : > { %p27_p1 = scmp.ge.s32.totalorder %s25_s15, 2  ;;  %p166_p2 = scmp.lt.s32.totalorder %s1066_s14, 3 }
   0x5   : > { %s1276_s15 = smov (%p27_p1, %s25_s15), 0  ;;  %p167_p3 = pnand %p844_p0, %p166_p2 }
   0x6   : > { %v1027_v0 = vld [vmem:[%s1270_s1] sm:$0x1f] (!%p167_p3)   ;;  %vm395_vm0 = vcmask (!%p167_p3), 1043456   ;;  %vm396_vm1 = vcmask (!%p167_p3), 1044480   ;;  %s845_s18 = sshll.u32 (!%p167_p3), %s1058_s12, 5  ;;  %v1068_v1 = vmov (!%p167_p3), 65535  }
   0x7   : > { %170 = sbr.rel (%p167_p3) target bundleno = 266 (0x10a), region = 32  ;;  %v397_v2 = vsel (!%p167_p3), %vm395_vm0, 4294967295, %v1068_v1  ;;  %p199_p4 = scmp.lt.s32.totalorder (!%p167_p3), %s845_s18, 63  ;;  %vm346_vm2 = vcmask (!%p167_p3), 72704   ;;  %v1155_v21 = vld [vmem:[%s1271_s2] ss:$0 sm:$0xff] (!%p167_p3) }
   0x8   : > { %v398_v3 = vsel (!%p167_p3), %vm396_vm1, %v397_v2, 0  ;;  %vm723_vm3 = vcmask (!%p167_p3), 519168  }
   0x9   : > { %v400_v4 = vand.u32 (!%p167_p3), %v1027_v0, %v398_v3 }
   0xb   : > { %966 = vmatprep.subr.bf16.mxu0 (!%p167_p3), %v400_v4  ;;  %1000 = vmatprep.subr.bf16.mxu1 (!%p167_p3), %v400_v4 }
   0xc   : > { %967 = vmatpush3.bf16.msra.mxu0 (!%p167_p3), %v400_v4  ;;  %1001 = vmatpush3.bf16.msra.mxu1 (!%p167_p3), %v400_v4 }
   0xe   : > { %s1278_s18 = smov (!%p199_p4, %s845_s18), 63 }
   0xf   : > { %s846_s19 = sshll.u32 %s1278_s18, 2 }
  0x10   : > { %s1118_s22 = scalar_lea.vmem %s1269_s0, %s846_s19  ;;  %s1167_s27 = scalar_lea.vmem %s1272_s3, %s846_s19 }
  0x11   : > { %v1028_v5 = vld [vmem:[%s1118_s22] sm:$0xff]   ;;  %v1030_v7 = vld [vmem:[%s1118_s22 + $0x8] sm:$0xff]   ;;  %v1032_v9 = vld [vmem:[%s1118_s22 + $0x10] sm:$0xff]  }
  0x12   : > { %v1029_v6 = vld [vmem:[%s1118_s22 + $0x40] sm:$0xff]   ;;  %968 = vmatprep.mubr.msk.bf16.mxu0 %vm346_vm2, %v1028_v5  ;;  %v1031_v8 = vld [vmem:[%s1118_s22 + $0x48] sm:$0xff]   ;;  %v1033_v10 = vld [vmem:[%s1118_s22 + $0x50] sm:$0xff]  }
  0x13   : > { %984 = vmatprep.mubr.msk.bf16.mxu1 %vm346_vm2, %v1029_v6  ;;  %969 = vmatmul.mubr.msk.bf16.vlgmr.msra.gmra.mrb[0].mxu0 %vm346_vm2, %v1030_v7  ;;  %v1034_v11 = vld [vmem:[%s1118_s22 + $0x18] sm:$0xff]   ;;  %v1036_v13 = vld [vmem:[%s1118_s22 + $0x20] sm:$0xff]   ;;  %v1038_v15 = vld [vmem:[%s1118_s22 + $0x28] sm:$0xff]  }
  0x14   : > { %985 = vmatmul.mubr.msk.bf16.vlgmr.msra.gmra.mrb[0].mxu1 %vm346_vm2, %v1031_v8  ;;  %972 = vmatprep.mubr.msk.bf16.mxu0 %vm346_vm2, %v1032_v9  ;;  %v1035_v12 = vld [vmem:[%s1118_s22 + $0x58] sm:$0xff]   ;;  %v1037_v14 = vld [vmem:[%s1118_s22 + $0x60] sm:$0xff]   ;;  %v1039_v16 = vld [vmem:[%s1118_s22 + $0x68] sm:$0xff]  }
  0x15   : > { %988 = vmatprep.mubr.msk.bf16.mxu1 %vm346_vm2, %v1033_v10  ;;  %v1040_v17 = vld [vmem:[%s1118_s22 + $0x30] sm:$0xff]   ;;  %v1042_v19 = vld [vmem:[%s1118_s22 + $0x38] sm:$0xff]  }
  0x16   : > { %v1041_v18 = vld [vmem:[%s1118_s22 + $0x70] sm:$0xff]   ;;  %v1043_v20 = vld [vmem:[%s1118_s22 + $0x78] sm:$0xff]  }
  0x1b   : > { %973 = vmatmul.mubr.msk.bf16.gmra.mrb[4].mxu0 %vm346_vm2, %v1034_v11 }
  0x1c   : > { %989 = vmatmul.mubr.msk.bf16.gmra.mrb[4].mxu1 %vm346_vm2, %v1035_v12  ;;  %976 = vmatprep.mubr.msk.bf16.mxu0 %vm346_vm2, %v1036_v13 }
  0x1d   : > { %992 = vmatprep.mubr.msk.bf16.mxu1 %vm346_vm2, %v1037_v14 }
  0x23   : > { %977 = vmatmul.mubr.msk.bf16.gmra.mrb[8].mxu0 %vm346_vm2, %v1038_v15 }
  0x24   : > { %993 = vmatmul.mubr.msk.bf16.gmra.mrb[8].mxu1 %vm346_vm2, %v1039_v16  ;;  %980 = vmatprep.mubr.msk.bf16.mxu0 %vm346_vm2, %v1040_v17 }
  0x25   : > { %996 = vmatprep.mubr.msk.bf16.mxu1 %vm346_vm2, %v1041_v18 }
  0x2b   : > { %981 = vmatmul.mubr.msk.bf16.gmra.mrb[12].mxu0 %vm346_vm2, %v1042_v19 }
  0x2c   : > { %997 = vmatmul.mubr.msk.bf16.gmra.mrb[12].mxu1 %vm346_vm2, %v1043_v20 }
  0xe6   : > { %v970_v22 = vpop.f32.mrb[0].mxu0 }
  0xe7   : > { %v445_v23 = vadd.f32 %v970_v22, %v1155_v21  ;;  %v986_v24 = vpop.f32.mrb[0].mxu1  ;;  %v436_v25 = vpop.f32.mrb[1].mxu0 }
  0xe8   : > { %v509_v26 = vadd.f32 %v986_v24, %v1155_v21  ;;  %v437_v27 = vadd.f32 %v1155_v21, %v436_v25  ;;  %v500_v28 = vpop.f32.mrb[1].mxu1  ;;  %v971_v29 = vpop.f32.mrb[2].mxu0 }
  0xe9   : > { %v565_v30 = vmax.f32 %v445_v23, 0.0  ;;  %v501_v31 = vadd.f32 %v1155_v21, %v500_v28  ;;  %v448_v32 = vadd.f32 %v971_v29, %v1155_v21  ;;  %v987_v33 = vpop.f32.mrb[2].mxu1  ;;  %v439_v34 = vpop.f32.mrb[3].mxu0 }
  0xea   : > { %v581_v35 = vmax.f32 %v509_v26, 0.0  ;;  %v563_v36 = vmax.f32 %v437_v27, 0.0  ;;  %v512_v37 = vadd.f32 %v987_v33, %v1155_v21  ;;  %v440_v38 = vadd.f32 %v1155_v21, %v439_v34  ;;  %v503_v39 = vpop.f32.mrb[3].mxu1 }
  0xeb   : > { %v919_v40 = vpack.c.bf16 %v565_v30, %v565_v30  ;;  %v579_v41 = vmax.f32 %v501_v31, 0.0  ;;  %v566_v42 = vmax.f32 %v448_v32, 0.0  ;;  %v504_v43 = vadd.f32 %v1155_v21, %v503_v39 }
  0xec   : > { %v935_v44 = vpack.c.bf16 %v581_v35, %v581_v35  ;;  %v917_v45 = vpack.c.bf16 %v563_v36, %v563_v36  ;;  %v582_v46 = vmax.f32 %v512_v37, 0.0  ;;  %v564_v47 = vmax.f32 %v440_v38, 0.0 }
  0xed   : > { %726 = vst.msk [vmem:[%s1167_s27 + $0x8] sm:$0xf] %vm723_vm3, %v919_v40  ;;  %v933_v48 = vpack.c.bf16 %v579_v41, %v579_v41  ;;  %v920_v49 = vpack.c.bf16 %v566_v42, %v566_v42  ;;  %v580_v50 = vmax.f32 %v504_v43, 0.0 }
  0xee   : > { %742 = vst.msk [vmem:[%s1167_s27 + $0x48] sm:$0xf] %vm723_vm3, %v935_v44  ;;  %724 = vst.msk [vmem:[%s1167_s27] sm:$0xf] %vm723_vm3, %v917_v45  ;;  %v936_v51 = vpack.c.bf16 %v582_v46, %v582_v46  ;;  %v918_v52 = vpack.c.bf16 %v564_v47, %v564_v47  ;;  %v974_v53 = vpop.f32.mrb[4].mxu0 }
  0xef   : > { %740 = vst.msk [vmem:[%s1167_s27 + $0x40] sm:$0xf] %vm723_vm3, %v933_v48  ;;  %727 = vst.msk [vmem:[%s1167_s27 + $0xc] sm:$0xf] %vm723_vm3, %v920_v49  ;;  %v934_v54 = vpack.c.bf16 %v580_v50, %v580_v50  ;;  %v461_v55 = vadd.f32 %v974_v53, %v1155_v21  ;;  %v990_v56 = vpop.f32.mrb[4].mxu1  ;;  %v452_v57 = vpop.f32.mrb[5].mxu0 }
  0xf0   : > { %743 = vst.msk [vmem:[%s1167_s27 + $0x4c] sm:$0xf] %vm723_vm3, %v936_v51  ;;  %725 = vst.msk [vmem:[%s1167_s27 + $0x4] sm:$0xf] %vm723_vm3, %v918_v52  ;;  %v525_v58 = vadd.f32 %v990_v56, %v1155_v21  ;;  %v453_v59 = vadd.f32 %v1155_v21, %v452_v57  ;;  %v516_v60 = vpop.f32.mrb[5].mxu1  ;;  %v975_v61 = vpop.f32.mrb[6].mxu0 }
  0xf1   : > { %741 = vst.msk [vmem:[%s1167_s27 + $0x44] sm:$0xf] %vm723_vm3, %v934_v54  ;;  %v569_v62 = vmax.f32 %v461_v55, 0.0  ;;  %v517_v63 = vadd.f32 %v1155_v21, %v516_v60  ;;  %v464_v0 = vadd.f32 %v975_v61, %v1155_v21  ;;  %v991_v1 = vpop.f32.mrb[6].mxu1  ;;  %v455_v2 = vpop.f32.mrb[7].mxu0 }
  0xf2   : > { %v585_v3 = vmax.f32 %v525_v58, 0.0  ;;  %v567_v4 = vmax.f32 %v453_v59, 0.0  ;;  %v528_v5 = vadd.f32 %v991_v1, %v1155_v21  ;;  %v456_v6 = vadd.f32 %v1155_v21, %v455_v2  ;;  %v519_v7 = vpop.f32.mrb[7].mxu1 }
  0xf3   : > { %v923_v8 = vpack.c.bf16 %v569_v62, %v569_v62  ;;  %v583_v9 = vmax.f32 %v517_v63, 0.0  ;;  %v570_v10 = vmax.f32 %v464_v0, 0.0  ;;  %v520_v11 = vadd.f32 %v1155_v21, %v519_v7 }
  0xf4   : > { %v939_v12 = vpack.c.bf16 %v585_v3, %v585_v3  ;;  %v921_v13 = vpack.c.bf16 %v567_v4, %v567_v4  ;;  %v586_v14 = vmax.f32 %v528_v5, 0.0  ;;  %v568_v15 = vmax.f32 %v456_v6, 0.0 }
  0xf5   : > { %730 = vst.msk [vmem:[%s1167_s27 + $0x18] sm:$0xf] %vm723_vm3, %v923_v8  ;;  %v937_v16 = vpack.c.bf16 %v583_v9, %v583_v9  ;;  %v924_v17 = vpack.c.bf16 %v570_v10, %v570_v10  ;;  %v584_v18 = vmax.f32 %v520_v11, 0.0 }
  0xf6   : > { %746 = vst.msk [vmem:[%s1167_s27 + $0x58] sm:$0xf] %vm723_vm3, %v939_v12  ;;  %728 = vst.msk [vmem:[%s1167_s27 + $0x10] sm:$0xf] %vm723_vm3, %v921_v13  ;;  %v940_v19 = vpack.c.bf16 %v586_v14, %v586_v14  ;;  %v922_v20 = vpack.c.bf16 %v568_v15, %v568_v15  ;;  %v978_v22 = vpop.f32.mrb[8].mxu0 }
  0xf7   : > { %744 = vst.msk [vmem:[%s1167_s27 + $0x50] sm:$0xf] %vm723_vm3, %v937_v16  ;;  %731 = vst.msk [vmem:[%s1167_s27 + $0x1c] sm:$0xf] %vm723_vm3, %v924_v17  ;;  %v938_v23 = vpack.c.bf16 %v584_v18, %v584_v18  ;;  %v477_v24 = vadd.f32 %v978_v22, %v1155_v21  ;;  %v994_v25 = vpop.f32.mrb[8].mxu1  ;;  %v468_v26 = vpop.f32.mrb[9].mxu0 }
  0xf8   : > { %747 = vst.msk [vmem:[%s1167_s27 + $0x5c] sm:$0xf] %vm723_vm3, %v940_v19  ;;  %729 = vst.msk [vmem:[%s1167_s27 + $0x14] sm:$0xf] %vm723_vm3, %v922_v20  ;;  %v541_v27 = vadd.f32 %v994_v25, %v1155_v21  ;;  %v469_v28 = vadd.f32 %v1155_v21, %v468_v26  ;;  %v532_v29 = vpop.f32.mrb[9].mxu1  ;;  %v979_v30 = vpop.f32.mrb[10].mxu0 }
  0xf9   : > { %745 = vst.msk [vmem:[%s1167_s27 + $0x54] sm:$0xf] %vm723_vm3, %v938_v23  ;;  %v573_v31 = vmax.f32 %v477_v24, 0.0  ;;  %v533_v32 = vadd.f32 %v1155_v21, %v532_v29  ;;  %v480_v33 = vadd.f32 %v979_v30, %v1155_v21  ;;  %v995_v34 = vpop.f32.mrb[10].mxu1  ;;  %v471_v35 = vpop.f32.mrb[11].mxu0 }
  0xfa   : > { %v589_v36 = vmax.f32 %v541_v27, 0.0  ;;  %v571_v37 = vmax.f32 %v469_v28, 0.0  ;;  %v544_v38 = vadd.f32 %v995_v34, %v1155_v21  ;;  %v472_v39 = vadd.f32 %v1155_v21, %v471_v35  ;;  %v535_v40 = vpop.f32.mrb[11].mxu1 }
  0xfb   : > { %v927_v41 = vpack.c.bf16 %v573_v31, %v573_v31  ;;  %v587_v42 = vmax.f32 %v533_v32, 0.0  ;;  %v574_v43 = vmax.f32 %v480_v33, 0.0  ;;  %v536_v44 = vadd.f32 %v1155_v21, %v535_v40 }
  0xfc   : > { %v943_v45 = vpack.c.bf16 %v589_v36, %v589_v36  ;;  %v925_v46 = vpack.c.bf16 %v571_v37, %v571_v37  ;;  %v590_v47 = vmax.f32 %v544_v38, 0.0  ;;  %v572_v48 = vmax.f32 %v472_v39, 0.0 }
  0xfd   : > { %734 = vst.msk [vmem:[%s1167_s27 + $0x28] sm:$0xf] %vm723_vm3, %v927_v41  ;;  %v941_v49 = vpack.c.bf16 %v587_v42, %v587_v42  ;;  %v928_v50 = vpack.c.bf16 %v574_v43, %v574_v43  ;;  %v588_v51 = vmax.f32 %v536_v44, 0.0 }
  0xfe   : > { %750 = vst.msk [vmem:[%s1167_s27 + $0x68] sm:$0xf] %vm723_vm3, %v943_v45  ;;  %732 = vst.msk [vmem:[%s1167_s27 + $0x20] sm:$0xf] %vm723_vm3, %v925_v46  ;;  %v944_v52 = vpack.c.bf16 %v590_v47, %v590_v47  ;;  %v926_v53 = vpack.c.bf16 %v572_v48, %v572_v48  ;;  %v982_v54 = vpop.f32.mrb[12].mxu0 }
  0xff   : > { %748 = vst.msk [vmem:[%s1167_s27 + $0x60] sm:$0xf] %vm723_vm3, %v941_v49  ;;  %735 = vst.msk [vmem:[%s1167_s27 + $0x2c] sm:$0xf] %vm723_vm3, %v928_v50  ;;  %v942_v55 = vpack.c.bf16 %v588_v51, %v588_v51  ;;  %v493_v56 = vadd.f32 %v982_v54, %v1155_v21  ;;  %v998_v57 = vpop.f32.mrb[12].mxu1  ;;  %v484_v58 = vpop.f32.mrb[13].mxu0 }
 0x100   : > { %751 = vst.msk [vmem:[%s1167_s27 + $0x6c] sm:$0xf] %vm723_vm3, %v944_v52  ;;  %733 = vst.msk [vmem:[%s1167_s27 + $0x24] sm:$0xf] %vm723_vm3, %v926_v53  ;;  %v557_v59 = vadd.f32 %v998_v57, %v1155_v21  ;;  %v485_v60 = vadd.f32 %v1155_v21, %v484_v58  ;;  %v548_v61 = vpop.f32.mrb[13].mxu1  ;;  %v983_v62 = vpop.f32.mrb[14].mxu0 }
 0x101   : > { %749 = vst.msk [vmem:[%s1167_s27 + $0x64] sm:$0xf] %vm723_vm3, %v942_v55  ;;  %v577_v63 = vmax.f32 %v493_v56, 0.0  ;;  %v549_v0 = vadd.f32 %v1155_v21, %v548_v61  ;;  %v496_v1 = vadd.f32 %v983_v62, %v1155_v21  ;;  %v999_v2 = vpop.f32.mrb[14].mxu1  ;;  %v487_v3 = vpop.f32.mrb[15].mxu0 }
 0x102   : > { %v593_v4 = vmax.f32 %v557_v59, 0.0  ;;  %v575_v5 = vmax.f32 %v485_v60, 0.0  ;;  %v560_v6 = vadd.f32 %v999_v2, %v1155_v21  ;;  %v488_v7 = vadd.f32 %v1155_v21, %v487_v3  ;;  %v551_v8 = vpop.f32.mrb[15].mxu1 }
 0x103   : > { %v931_v9 = vpack.c.bf16 %v577_v63, %v577_v63  ;;  %v591_v10 = vmax.f32 %v549_v0, 0.0  ;;  %v578_v11 = vmax.f32 %v496_v1, 0.0  ;;  %v552_v12 = vadd.f32 %v1155_v21, %v551_v8 }
 0x104   : > { %v947_v13 = vpack.c.bf16 %v593_v4, %v593_v4  ;;  %v929_v14 = vpack.c.bf16 %v575_v5, %v575_v5  ;;  %v594_v15 = vmax.f32 %v560_v6, 0.0  ;;  %v576_v16 = vmax.f32 %v488_v7, 0.0 }
 0x105   : > { %738 = vst.msk [vmem:[%s1167_s27 + $0x38] sm:$0xf] %vm723_vm3, %v931_v9  ;;  %v945_v17 = vpack.c.bf16 %v591_v10, %v591_v10  ;;  %v932_v18 = vpack.c.bf16 %v578_v11, %v578_v11  ;;  %v592_v19 = vmax.f32 %v552_v12, 0.0 }
 0x106   : > { %754 = vst.msk [vmem:[%s1167_s27 + $0x78] sm:$0xf] %vm723_vm3, %v947_v13  ;;  %736 = vst.msk [vmem:[%s1167_s27 + $0x30] sm:$0xf] %vm723_vm3, %v929_v14  ;;  %v948_v20 = vpack.c.bf16 %v594_v15, %v594_v15  ;;  %v930_v22 = vpack.c.bf16 %v576_v16, %v576_v16 }
 0x107   : > { %752 = vst.msk [vmem:[%s1167_s27 + $0x70] sm:$0xf] %vm723_vm3, %v945_v17  ;;  %739 = vst.msk [vmem:[%s1167_s27 + $0x3c] sm:$0xf] %vm723_vm3, %v932_v18  ;;  %v946_v21 = vpack.c.bf16 %v592_v19, %v592_v19 }
 0x108   : > { %755 = vst.msk [vmem:[%s1167_s27 + $0x7c] sm:$0xf] %vm723_vm3, %v948_v20  ;;  %737 = vst.msk [vmem:[%s1167_s27 + $0x34] sm:$0xf] %vm723_vm3, %v930_v22 }
 0x109   : > { %753 = vst.msk [vmem:[%s1167_s27 + $0x74] sm:$0xf] %vm723_vm3, %v946_v21 }
 0x10a PF: > { %s13_s14 = sadd.s32 1, %s1066_s14   ;;  %s1273_s12 = smov %s1062_s13 }
 0x10b   : > { %p10_p5 = scmp.ge.s32.totalorder %s13_s14, 4   ;;  %s1274_s13 = smov %s1276_s15 }
 0x10d   :  { %12 = sbr.rel (!%p10_p5) target bundleno = 2 (0x2), region = 65 }

</bundles_post_ra>
